<compile_context>
chip_gen: v7x
topology: tpu7x:2x2x1
jax: 0.10.0
libtpu: 0.0.40
codegen_flags: <defaults>
</compile_context>

<pallas_src>
import jax
import jax.numpy as jnp
from jax import lax
from jax.experimental import pallas as pl
from jax.experimental.pallas import tpu as pltpu

_LANE = 128
_SUBLANE = 8


def _round_up(n, m):
    return ((n + m - 1) // m) * m


def _pad2d(a, rows, cols):
    pr, pc = rows - a.shape[0], cols - a.shape[1]
    if pr or pc:
        a = jnp.pad(a, ((0, pr), (0, pc)))
    return a


def _joint_mlp_kernel(x_ref, w1_ref, w2_ref, o_ref):
    # x_ref:  (tm, Din)    bf16
    # w1_ref: (Dmid, Din)  bf16  (PyTorch [out, in] layout)
    # w2_ref: (Dout, Dmid) bf16  (PyTorch [out, in] layout)
    # o_ref:  (tm, Dout)   f32
    x = x_ref[...]
    w1 = w1_ref[...]
    w2 = w2_ref[...]

    # x @ W1^T : contract x's feature axis with W1's in-feature axis directly.
    h = lax.dot_general(
        x, w1,
        dimension_numbers=(((1,), (1,)), ((), ())),
        preferred_element_type=jnp.float32,
    )
    h = jnp.maximum(h, 0.0)  # ReLU in f32 (fine on all generations, incl. v5e)

    # relu(h) @ W2^T
    y = lax.dot_general(
        h.astype(jnp.bfloat16), w2,
        dimension_numbers=(((1,), (1,)), ((), ())),
        preferred_element_type=jnp.float32,
    )
    o_ref[...] = y.astype(o_ref.dtype)


def _pick_tm(batch_pad8, d_in, d_mid, d_out, *, vmem_budget=32 * 1024 * 1024):
    # Resident bf16 weights (pipeline may double-buffer them) + per-batch-row
    # cost: double-buffered bf16 x/out tiles + f32 intermediates/accumulators.
    w_bytes = 2 * 2 * (d_mid * d_in + d_out * d_mid)
    per_row = 2 * 2 * (d_in + d_out) + 4 * (d_mid + d_out)
    avail = max(vmem_budget - w_bytes, 1 << 20)
    tm = avail // max(per_row, 1)
    tm = max(_SUBLANE, min(512, (tm // _SUBLANE) * _SUBLANE))
    return min(tm, batch_pad8)


def joint_mlp(x, w1, w2, *, tm=None):
    """JointMLP forward: relu(x @ w1.T) @ w2.T   (no biases).

    x:  [B, 2H] float32
    w1: [2H, 2H] PyTorch Linear weight ([out, in])
    w2: [H, 2H]  PyTorch Linear weight ([out, in])
    """
    B, d_in = x.shape
    d_mid, d_in_w1 = w1.shape
    d_out, d_mid_w2 = w2.shape
    assert d_in_w1 == d_in and d_mid_w2 == d_mid

    # Lane-dense padding (no-op when dims are already multiples of 128).
    d_in_p = _round_up(d_in, _LANE)
    d_mid_p = _round_up(d_mid, _LANE)
    d_out_p = _round_up(d_out, _LANE)

    if tm is None:
        tm = _pick_tm(_round_up(B, _SUBLANE), d_in_p, d_mid_p, d_out_p)
    tm = max(_SUBLANE, (tm // _SUBLANE) * _SUBLANE)
    b_p = _round_up(B, tm)

    # bf16 MXU operands (f32 accumulation inside the kernel); halves DMA bytes.
    x_p = _pad2d(x, b_p, d_in_p).astype(jnp.bfloat16)
    w1_p = _pad2d(w1, d_mid_p, d_in_p).astype(jnp.bfloat16)
    w2_p = _pad2d(w2, d_out_p, d_mid_p).astype(jnp.bfloat16)

    out = pl.pallas_call(
        _joint_mlp_kernel,
        out_shape=jax.ShapeDtypeStruct((b_p, d_out_p), jnp.float32),
        grid_spec=pltpu.PrefetchScalarGridSpec(
            num_scalar_prefetch=0,
            grid=(b_p // tm,),
            in_specs=[
                pl.BlockSpec((tm, d_in_p), lambda i: (i, 0)),      # x tile
                pl.BlockSpec((d_mid_p, d_in_p), lambda i: (0, 0)),  # W1 resident
                pl.BlockSpec((d_out_p, d_mid_p), lambda i: (0, 0)),  # W2 resident
            ],
            out_specs=pl.BlockSpec((tm, d_out_p), lambda i: (i, 0)),
        ),
        compiler_params=pltpu.CompilerParams(
            dimension_semantics=("parallel",),
            vmem_limit_bytes=64 * 1024 * 1024,
        ),
    )(x_p, w1_p, w2_p)

    # TODO(synk): for very large H where the resident bf16 weights exceed the
    # VMEM budget (notably v7x's 64 MiB), add N/K-reduction grid axes with a
    # VMEM f32 accumulator instead of keeping both weights fully resident.
    return out[:B, :d_out].astype(x.dtype)


if __name__ == "__main__":
    key = jax.random.PRNGKey(0)
    k_x, k_w1, k_w2 = jax.random.split(key, 3)

    hidden = 32                # config.hidden_size
    batch = 8
    d_in = 2 * hidden          # JointMLP input / intermediate width = 2H

    x = jax.random.normal(k_x, (batch, d_in), dtype=jnp.float32)
    # PyTorch Linear weight layout: [out_features, in_features], no biases.
    w1 = jax.random.normal(k_w1, (d_in, d_in), dtype=jnp.float32) * 0.05
    w2 = jax.random.normal(k_w2, (hidden, d_in), dtype=jnp.float32) * 0.05

    out = joint_mlp(x, w1, w2)
    out = jax.block_until_ready(out)

    # Reference: same math as PyTorch JointMLP forward, in f32.
    ref = jnp.maximum(x @ w1.T, 0.0) @ w2.T
    assert out.shape == ref.shape
    assert jnp.allclose(out, ref, atol=2e-2, rtol=2e-2), float(
        jnp.max(jnp.abs(out - ref)))

    print("KERNEL_OK")
</pallas_src>

<mosaic_0001>
module attributes {stable_mosaic.version = 11 : i64} {
  func.func @_joint_mlp_kernel(%arg0: i32, %arg1: memref<8x128xbf16, #tpu.memory_space<vmem>>, %arg2: memref<128x128xbf16, #tpu.memory_space<vmem>>, %arg3: memref<128x128xbf16, #tpu.memory_space<vmem>>, %arg4: memref<8x128xf32, #tpu.memory_space<vmem>>) attributes {dimension_semantics = [#tpu.dimension_semantics<parallel>], iteration_bounds = array<i64: 1>, scalar_prefetch = 0 : i64, scratch_operands = 0 : i64, tpu.core_type = #tpu.core_type<tc>, window_params = [{transform_indices = @transform_0, window_bounds = array<i64: 8, 128>}, {pipeline_mode = #tpu.pipeline_mode<synchronous>, transform_indices = @transform_1, window_bounds = array<i64: 128, 128>}, {pipeline_mode = #tpu.pipeline_mode<synchronous>, transform_indices = @transform_2, window_bounds = array<i64: 128, 128>}, {transform_indices = @transform_3, window_bounds = array<i64: 8, 128>}]} {
    %c0 = arith.constant 0 : index
    %c0_0 = arith.constant 0 : index
    %0 = vector.load %arg1[%c0, %c0_0] : memref<8x128xbf16, #tpu.memory_space<vmem>>, vector<8x128xbf16>
    %c0_1 = arith.constant 0 : index
    %c0_2 = arith.constant 0 : index
    %1 = vector.load %arg2[%c0_1, %c0_2] : memref<128x128xbf16, #tpu.memory_space<vmem>>, vector<128x128xbf16>
    %c0_3 = arith.constant 0 : index
    %c0_4 = arith.constant 0 : index
    %2 = vector.load %arg3[%c0_3, %c0_4] : memref<128x128xbf16, #tpu.memory_space<vmem>>, vector<128x128xbf16>
    %cst = arith.constant dense<0.000000e+00> : vector<8x128xf32>
    %3 = tpu.matmul %0, %1, %cst {dimension_numbers = #tpu.dot_dimension_numbers<[1], [1], [0], [0], [0, 0, 1, 0], [], []>} : vector<8x128xbf16>, vector<128x128xbf16>, vector<8x128xf32> -> vector<8x128xf32>
    %cst_5 = arith.constant 0.000000e+00 : f32
    %4 = vector.broadcast %cst_5 : f32 to vector<8x128xf32>
    %5 = arith.maximumf %3, %4 : vector<8x128xf32>
    %6 = arith.truncf %5 : vector<8x128xf32> to vector<8x128xbf16>
    %cst_6 = arith.constant dense<0.000000e+00> : vector<8x128xf32>
    %7 = tpu.matmul %6, %2, %cst_6 {dimension_numbers = #tpu.dot_dimension_numbers<[1], [1], [0], [0], [0, 0, 1, 0], [], []>} : vector<8x128xbf16>, vector<128x128xbf16>, vector<8x128xf32> -> vector<8x128xf32>
    %c0_7 = arith.constant 0 : index
    %c0_8 = arith.constant 0 : index
    %8 = vector.load %arg4[%c0_7, %c0_8] : memref<8x128xf32, #tpu.memory_space<vmem>>, vector<8x128xf32>
    tpu.vector_store %arg4[%c0_7, %c0_8], %7 {strides = array<i32>} : memref<8x128xf32, #tpu.memory_space<vmem>>, vector<8x128xf32>,
    return
  }
  func.func @transform_0(%arg0: i32) -> (i32, i32) {
    %c0_i32 = arith.constant 0 : i32
    %c0_i32_0 = arith.constant 0 : i32
    return %arg0, %c0_i32 : i32, i32
  }
  func.func @transform_1(%arg0: i32) -> (i32, i32) {
    %c0_i32 = arith.constant 0 : i32
    %c0_i32_0 = arith.constant 0 : i32
    %c0_i32_1 = arith.constant 0 : i32
    return %c0_i32, %c0_i32_0 : i32, i32
  }
  func.func @transform_2(%arg0: i32) -> (i32, i32) {
    %c0_i32 = arith.constant 0 : i32
    %c0_i32_0 = arith.constant 0 : i32
    %c0_i32_1 = arith.constant 0 : i32
    return %c0_i32, %c0_i32_0 : i32, i32
  }
  func.func @transform_3(%arg0: i32) -> (i32, i32) {
    %c0_i32 = arith.constant 0 : i32
    %c0_i32_0 = arith.constant 0 : i32
    return %arg0, %c0_i32 : i32, i32
  }
}

</mosaic_0001>

<bundles_post_ra>
// kernel: tpu_custom_call.1
= control target key start
LH: loop header
LB: loop body
LE: loop exit
PB: predicated region body
PF: predicated region fallthrough
CT: control target
= control target key end

     0   :  { %8 = vsyncpa [#allocation3], 0  ;;  %s557_s0 = inlined_call_operand.hbm [shape: bf16[8,128], index: 0, kind: input, shape index: {}]   ;;  %s558_s1 = inlined_call_operand.hbm [shape: bf16[128,128], index: 1, kind: input, shape index: {}]   ;;  %s559_s2 = inlined_call_operand.hbm [shape: bf16[128,128], index: 2, kind: input, shape index: {}]   ;;  %s560_s3 = inlined_call_operand.hbm [shape: f32[8,128], index: 3, kind: output, shape index: {}]  }
   0x1   :  { %9 = vsyncpa [#allocation6], 0 }
   0x2   :  { %10 = vsyncpa [#allocation4], 0  ;;  %s475_s12 = smov [#allocation5]   ;;  %s381_s16 = scalar_lea.hbm %s558_s1, 1024 }
   0x3   :  { %s26_s13 = sshll.u32 %s475_s12, 4  ;;  %p382_p0 = scmp.ne.s32.totalorder %s558_s1, %s381_s16  ;;  %s27_s13 = int_to_ptr.vmem [resolvable:$true] %s26_s13 }
   0x4   :  { %p385_p1 = scmp.lt.u32.totalorder %s381_s16, %s558_s1 }
   0x6   :  { %p387_p2 = pnand %p385_p1, %p382_p0 }
   0x8   :  { %390 = shalt.err (!%p387_p2)
}
   0x9   :  { %s391_s21 = scalar_lea.vmem %s27_s13, 1024  ;;  %p396_p4 = scmp.lt.s32.totalorder %s27_s13, %s27_s13 }
   0xa   :  { %p392_p3 = scmp.ne.s32.totalorder %s27_s13, %s391_s21  ;;  %p397_p5 = scmp.lt.s32.totalorder %s391_s21, %s391_s21 }
   0xc   :  { %p398_p6 = por %p397_p5, %p396_p4 }
   0xe   :  { %p399_p7 = pnand %p398_p6, %p392_p3 }
  0x10   :  { %402 = shalt.err (!%p399_p7)
}
  0x11   :  { %s476_s22 = smov 64   ;;  %s477_s23 = smov 4  }
  0x12   :  { %32 = dma.hbm_to_vmem [thread:$0]  %s558_s1, 1024, %s27_s13, [#allocation6], %s476_s22, %s476_s22, %s477_s23  }
  0x13   :  { %s478_s26 = smov [#allocation2]   ;;  %s479_s28 = smov [#allocation7]  }
  0x14   :  { %s17_s27 = sshll.u32 %s478_s26, 4  ;;  %s38_s29 = sshll.u32 %s479_s28, 4  ;;  %s18_s27 = int_to_ptr.vmem [resolvable:$true] %s17_s27  ;;  %s39_s29 = int_to_ptr.vmem [resolvable:$true] %s38_s29 }
  0x15   :  { %s403_s5 = scalar_lea.hbm %s557_s0, 64 }
  0x16   :  { %p404_p8 = scmp.ne.s32.totalorder %s557_s0, %s403_s5  ;;  %p407_p9 = scmp.lt.u32.totalorder %s403_s5, %s557_s0 }
  0x18   :  { %p409_p10 = pnand %p407_p9, %p404_p8 }
  0x1a   :  { %412 = shalt.err (!%p409_p10)
}
  0x1b   :  { %s413_s1 = scalar_lea.vmem %s18_s27, 64  ;;  %p418_p12 = scmp.lt.s32.totalorder %s18_s27, %s18_s27 }
  0x1c   :  { %p414_p11 = scmp.ne.s32.totalorder %s18_s27, %s413_s1  ;;  %p419_p13 = scmp.lt.s32.totalorder %s413_s1, %s413_s1 }
  0x1e   :  { %p420_p0 = por %p419_p13, %p418_p12 }
  0x20   :  { %p421_p1 = pnand %p420_p0, %p414_p11 }
  0x22   :  { %424 = shalt.err (!%p421_p1)
}
  0x23   :  { %20 = dma.hbm_to_vmem [thread:$0]  %s557_s0, 64, %s18_s27, [#allocation3]  }
  0x24   :  { %s425_s14 = scalar_lea.hbm %s559_s2, 1024 }
  0x25   :  { %p426_p2 = scmp.ne.s32.totalorder %s559_s2, %s425_s14  ;;  %p429_p3 = scmp.lt.u32.totalorder %s425_s14, %s559_s2 }
  0x27   :  { %p431_p4 = pnand %p429_p3, %p426_p2 }
  0x29   :  { %434 = shalt.err (!%p431_p4)
}
  0x2a   :  { %s435_s19 = scalar_lea.vmem %s39_s29, 1024  ;;  %p440_p6 = scmp.lt.s32.totalorder %s39_s29, %s39_s29 }
  0x2b   :  { %p436_p5 = scmp.ne.s32.totalorder %s39_s29, %s435_s19  ;;  %p441_p7 = scmp.lt.s32.totalorder %s435_s19, %s435_s19 }
  0x2d   :  { %p442_p8 = por %p441_p7, %p440_p6 }
  0x2f   :  { %p443_p9 = pnand %p442_p8, %p436_p5 }
  0x31   :  { %446 = shalt.err (!%p443_p9)
}
  0x32   :  { %44 = dma.hbm_to_vmem [thread:$0]  %s559_s2, 1024, %s39_s29, [#allocation6], %s476_s22, %s476_s22, %s477_s23  }
  0x33   :  { %469 = dma.done.wait [#allocation3], 64  }
  0x34   :  { %470 = vsyncadd [#allocation3], 4294967232 }
  0x35   :  { %471 = dma.done.wait [#allocation6], 2048  }
  0x36   :  { %472 = vsyncadd [#allocation6], 4294965248  ;;  %v480_v0 = vmov 0.0   ;;  %vm481_vm0 = vmmov 0   ;;  %v365_v1 = vld [vmem:[#allocation5] sm:$0xff]   ;;  %v366_v2 = vld [vmem:[#allocation5 + $0x8] sm:$0xff]  }
  0x37   :  { %317 = vmatprep.subr.bf16.mxu0 %v480_v0  ;;  %333 = vmatprep.mubr.msk.bf16.mxu0 %vm481_vm0, %v480_v0  ;;  %v373_v3 = vld [vmem:[#allocation7] sm:$0xff]   ;;  %v367_v4 = vld [vmem:[#allocation5 + $0x10] sm:$0xff]   ;;  %v374_v5 = vld [vmem:[#allocation7 + $0x8] sm:$0xff]   ;;  %s482_s2 = smov [#allocation8]  }
  0x38   :  { %337 = vmatprep.subr.bf16.mxu1 %v480_v0  ;;  %353 = vmatprep.mubr.msk.bf16.mxu1 %vm481_vm0, %v480_v0  ;;  %v368_v6 = vld [vmem:[#allocation5 + $0x18] sm:$0xff]   ;;  %v375_v7 = vld [vmem:[#allocation7 + $0x10] sm:$0xff]   ;;  %v369_v8 = vld [vmem:[#allocation5 + $0x20] sm:$0xff]   ;;  %s273_s21 = sshll.u32 %s482_s2, 4  ;;  %s274_s21 = int_to_ptr.vmem [resolvable:$true] %s273_s21 }
  0x39   :  { %318 = vmatpush3.bf16.xpose.msra.mxu0 %v365_v1  ;;  %338 = vmatpush3.bf16.xpose.msra.mxu1 %v373_v3  ;;  %v376_v9 = vld [vmem:[#allocation7 + $0x18] sm:$0xff]   ;;  %v370_v10 = vld [vmem:[#allocation5 + $0x28] sm:$0xff]   ;;  %v377_v11 = vld [vmem:[#allocation7 + $0x20] sm:$0xff]   ;;  %s447_s22 = scalar_lea.vmem %s274_s21, 128  ;;  %p452_p11 = scmp.lt.s32.totalorder %s274_s21, %s274_s21 }
  0x3a   :  { %319 = vmatprep.subr.bf16.mxu0 %v480_v0  ;;  %339 = vmatprep.subr.bf16.mxu1 %v480_v0  ;;  %v371_v12 = vld [vmem:[#allocation5 + $0x30] sm:$0xff]   ;;  %v378_v13 = vld [vmem:[#allocation7 + $0x28] sm:$0xff]   ;;  %v372_v14 = vld [vmem:[#allocation5 + $0x38] sm:$0xff]   ;;  %p448_p10 = scmp.ne.s32.totalorder %s274_s21, %s447_s22  ;;  %p453_p12 = scmp.lt.s32.totalorder %s447_s22, %s447_s22 }
  0x3b   :  { %v379_v15 = vld [vmem:[#allocation7 + $0x30] sm:$0xff]   ;;  %v55_v16 = vld [vmem:[#allocation2] sm:$0xf] }
  0x3c   :  { %v380_v17 = vld [vmem:[#allocation7 + $0x38] sm:$0xff]   ;;  %p454_p13 = por %p453_p12, %p452_p11 }
  0x3e   :  { %p455_p0 = pnand %p454_p13, %p448_p10 }
  0x41   :  { %320 = vmatpush3.bf16.xpose.msra.mxu0 %v366_v2  ;;  %340 = vmatpush3.bf16.xpose.msra.mxu1 %v374_v5 }
  0x42   :  { %321 = vmatprep.subr.bf16.mxu0 %v480_v0  ;;  %341 = vmatprep.subr.bf16.mxu1 %v480_v0 }
  0x49   :  { %322 = vmatpush3.bf16.xpose.msra.mxu0 %v367_v4  ;;  %342 = vmatpush3.bf16.xpose.msra.mxu1 %v375_v7 }
  0x4a   :  { %323 = vmatprep.subr.bf16.mxu0 %v480_v0  ;;  %343 = vmatprep.subr.bf16.mxu1 %v480_v0 }
  0x51   :  { %324 = vmatpush3.bf16.xpose.msra.mxu0 %v368_v6  ;;  %344 = vmatpush3.bf16.xpose.msra.mxu1 %v376_v9 }
  0x52   :  { %325 = vmatprep.subr.bf16.mxu0 %v480_v0  ;;  %345 = vmatprep.subr.bf16.mxu1 %v480_v0 }
  0x59   :  { %326 = vmatpush3.bf16.xpose.msra.mxu0 %v369_v8  ;;  %346 = vmatpush3.bf16.xpose.msra.mxu1 %v377_v11 }
  0x5a   :  { %327 = vmatprep.subr.bf16.mxu0 %v480_v0  ;;  %347 = vmatprep.subr.bf16.mxu1 %v480_v0 }
  0x61   :  { %328 = vmatpush3.bf16.xpose.msra.mxu0 %v370_v10  ;;  %348 = vmatpush3.bf16.xpose.msra.mxu1 %v378_v13 }
  0x62   :  { %329 = vmatprep.subr.bf16.mxu0 %v480_v0  ;;  %349 = vmatprep.subr.bf16.mxu1 %v480_v0 }
  0x69   :  { %330 = vmatpush3.bf16.xpose.msra.mxu0 %v371_v12  ;;  %350 = vmatpush3.bf16.xpose.msra.mxu1 %v379_v15 }
  0x6a   :  { %331 = vmatprep.subr.bf16.mxu0 %v480_v0  ;;  %351 = vmatprep.subr.bf16.mxu1 %v480_v0 }
  0x71   :  { %332 = vmatpush3.bf16.xpose.msra.mxu0 %v372_v14  ;;  %352 = vmatpush3.bf16.xpose.msra.mxu1 %v380_v17 }
  0x78   :  { %334 = vmatmul.mubr.bf16.vlgmr.msra.gmra.mrb[0].mxu0 %v55_v16 }
 0x14b   :  { %v170_v18 = vpop.f32.mrb[0].mxu0 }
 0x14c   :  { %v176_v19 = vmax.f32 %v170_v18, 0.0  ;;  %v335_v20 = vpop.f32.mrb[1].mxu0 }
 0x14d   :  { %v173_v21 = vpop.f32.mrb[2].mxu0 }
 0x14e   :  { %v177_v22 = vpack.c.bf16 %v176_v19, %v176_v19  ;;  %v336_v23 = vpop.f32.mrb[3].mxu0 }
 0x150   :  { %354 = vmatmul.mubr.bf16.vlgmr.msra.gmra.mrb[0].mxu1 %v177_v22 }
 0x223   :  { %v260_v24 = vpop.f32.mrb[0].mxu1 }
 0x224   :  { %266 = vst [vmem:[#allocation8] sm:$0xff] %v260_v24  ;;  %v355_v25 = vpop.f32.mrb[1].mxu1 }
 0x225   :  { %v263_v26 = vpop.f32.mrb[2].mxu1 }
 0x226   :  { %458 = shalt.err (!%p455_p0)
}
 0x227   :  { %s459_s25 = scalar_lea.hbm %s560_s3, 128 }
 0x228   :  { %p460_p1 = scmp.ne.s32.totalorder %s560_s3, %s459_s25  ;;  %p463_p2 = scmp.lt.u32.totalorder %s459_s25, %s560_s3 }
 0x22a   :  { %p465_p3 = pnand %p463_p2, %p460_p1 }
 0x22c   :  { %468 = shalt.err (!%p465_p3)
}
 0x22d   :  { %276 = dma.vmem_to_hbm [thread:$0]  %s274_s21, 128, %s560_s3, [#allocation4]   ;;  %v356_v27 = vpop.f32.mrb[3].mxu1 }
 0x22e   :  { %473 = dma.done.wait [#allocation4], 128  }
 0x22f   :  { %474 = vsyncadd [#allocation4], 4294967168 }
 0x230   :  { %280 = vsyncpa [#allocation3], 1 }
 0x231   :  { %281 = vsyncpa [#allocation6], 1 }
 0x232   :  { %282 = vsyncpa [#allocation4], 1 }

</bundles_post_ra>
